<compile_context>
chip_gen: v7x
topology: tpu7x:2x2x1
jax: 0.10.0
libtpu: 0.0.40
codegen_flags: <defaults>
</compile_context>

<pallas_src>
import jax
import jax.numpy as jnp
from jax.experimental import pallas as pl
from jax.experimental.pallas import tpu as pltpu


def _round_up(n, m):
    return ((n + m - 1) // m) * m


def _mlp_kernel(x_ref, w1_ref, b1_ref, w2_ref, b2_ref, w3_ref, b3_ref, o_ref):
    # layer1: bf16 matmul on MXU, f32 accumulate; bias + tanh in f32 (EUP).
    h1 = jnp.tanh(
        jnp.dot(x_ref[...], w1_ref[...], preferred_element_type=jnp.float32)
        + b1_ref[...]
    )
    # dropout1 -> identity (eval mode)
    h1 = h1.astype(w2_ref.dtype)

    # layer2 + tanh
    h2 = jnp.tanh(
        jnp.dot(h1, w2_ref[...], preferred_element_type=jnp.float32)
        + b2_ref[...]
    )
    # dropout2 -> identity (eval mode)
    h2 = h2.astype(w3_ref.dtype)

    # output_layer (no activation)
    out = (
        jnp.dot(h2, w3_ref[...], preferred_element_type=jnp.float32)
        + b3_ref[...]
    )
    o_ref[...] = out.astype(o_ref.dtype)


def item_embedding_forward(x, params, *, tile_b=None, compute_dtype=jnp.bfloat16):
    """Fused forward pass of ItemEmbedding.

    x:      [B, input_size] float32
    params: dict with w1 [in,h], b1 [1,h], w2 [h,h], b2 [1,h], w3 [h,out], b3 [1,out]
            (weights stored transposed vs. PyTorch: kernel computes x @ W + b)

    Note: for tiny shapes (e.g. B<=16, H<=32) plain XLA fusion is at least as
    fast; the kernel pays off for large-batch / wide-layer deployments.
    """
    w1, b1, w2, b2, w3, b3 = (
        params["w1"], params["b1"], params["w2"], params["b2"],
        params["w3"], params["b3"],
    )
    B, D_in = x.shape
    H = w1.shape[1]
    D_out = w3.shape[1]

    # ---- lane / sublane padding -------------------------------------------
    D_in_p = _round_up(D_in, 128)
    H_p = _round_up(H, 128)
    D_out_p = _round_up(D_out, 128)

    if tile_b is None:
        # target a few hundred rows per tile so DMA/compute overlap and (on v7x)
        # both TensorCores get work; clamp to the (padded) batch for small B.
        tile_b = min(256, _round_up(B, 16))
    tile_b = _round_up(tile_b, 16)          # bf16 sublane packing = 16 rows
    B_p = _round_up(B, tile_b)

    def pad2(a, rows, cols):
        return jnp.pad(a, ((0, rows - a.shape[0]), (0, cols - a.shape[1])))

    # matmul inputs in bf16 (f32 accumulation inside the kernel), biases in f32.
    x_p = pad2(x, B_p, D_in_p).astype(compute_dtype)
    w1_p = pad2(w1, D_in_p, H_p).astype(compute_dtype)
    w2_p = pad2(w2, H_p, H_p).astype(compute_dtype)
    w3_p = pad2(w3, H_p, D_out_p).astype(compute_dtype)
    b1_p = pad2(b1.astype(jnp.float32), 1, H_p)
    b2_p = pad2(b2.astype(jnp.float32), 1, H_p)
    b3_p = pad2(b3.astype(jnp.float32), 1, D_out_p)

    grid = (B_p // tile_b,)

    # ---- VMEM budget (pipeline double-buffers every blocked operand) -------
    itemsize = jnp.dtype(compute_dtype).itemsize
    blk_bytes = 2 * (
        tile_b * D_in_p * itemsize                               # x tile
        + tile_b * D_out_p * 4                                   # out tile (f32)
        + (D_in_p * H_p + H_p * H_p + H_p * D_out_p) * itemsize  # weights
        + (2 * H_p + D_out_p) * 4                                # biases (f32)
    )
    # Keep the limit >= default scoped VMEM but never above v7x's safe ceiling.
    vmem_limit = int(min(48 * 1024 * 1024,
                         max(32 * 1024 * 1024, 2 * blk_bytes + (8 << 20))))

    out_p = pl.pallas_call(
        _mlp_kernel,
        out_shape=jax.ShapeDtypeStruct((B_p, D_out_p), jnp.float32),
        grid_spec=pltpu.PrefetchScalarGridSpec(
            num_scalar_prefetch=0,
            grid=grid,
            in_specs=[
                # x: tiled over batch (lane-padded feature dim)
                pl.BlockSpec((tile_b, D_in_p), lambda i: (i, 0)),
                # weights / biases: constant block index -> fetched once, resident
                pl.BlockSpec((D_in_p, H_p), lambda i: (0, 0)),
                pl.BlockSpec((1, H_p), lambda i: (0, 0)),
                pl.BlockSpec((H_p, H_p), lambda i: (0, 0)),
                pl.BlockSpec((1, H_p), lambda i: (0, 0)),
                pl.BlockSpec((H_p, D_out_p), lambda i: (0, 0)),
                pl.BlockSpec((1, D_out_p), lambda i: (0, 0)),
            ],
            out_specs=pl.BlockSpec((tile_b, D_out_p), lambda i: (i, 0)),
        ),
        compiler_params=pltpu.CompilerParams(
            dimension_semantics=("parallel",),
            vmem_limit_bytes=vmem_limit,
        ),
    )(x_p, w1_p, b1_p, w2_p, b2_p, w3_p, b3_p)

    # slice off batch / lane padding
    return out_p[:B, :D_out]


def init_params(key, input_size, hidden_size, output_size):
    """Deterministic synthetic init (uniform, roughly PyTorch Linear scale)."""
    ks = jax.random.split(key, 6)

    def lin(kw, kb, fan_in, fan_out):
        bound = 1.0 / jnp.sqrt(fan_in)
        w = jax.random.uniform(kw, (fan_in, fan_out), jnp.float32, -bound, bound)
        b = jax.random.uniform(kb, (1, fan_out), jnp.float32, -bound, bound)
        return w, b

    w1, b1 = lin(ks[0], ks[1], input_size, hidden_size)
    w2, b2 = lin(ks[2], ks[3], hidden_size, hidden_size)
    w3, b3 = lin(ks[4], ks[5], hidden_size, output_size)
    return {"w1": w1, "b1": b1, "w2": w2, "b2": b2, "w3": w3, "b3": b3}


def reference_forward(x, p):
    h1 = jnp.tanh(x @ p["w1"] + p["b1"])
    h2 = jnp.tanh(h1 @ p["w2"] + p["b2"])
    return h2 @ p["w3"] + p["b3"]


if __name__ == "__main__":
    key = jax.random.PRNGKey(0)
    k_x, k_p = jax.random.split(key)

    batch = 128
    input_size = 16
    hidden_size = 32
    output_size = 8

    x = jax.random.normal(k_x, (batch, input_size), dtype=jnp.float32)
    params = init_params(k_p, input_size, hidden_size, output_size)

    # tile_b=32 -> 4 grid steps: exercises the pipeline / parallel batch axis.
    out = item_embedding_forward(x, params, tile_b=32)
    out = jax.block_until_ready(out)

    ref = reference_forward(x, params)
    assert out.shape == (batch, output_size)
    # bf16 matmul inputs with f32 accumulation -> ~1e-2 relative error vs f32 ref.
    assert jnp.allclose(out, ref, atol=5e-2, rtol=5e-2), "mismatch vs reference"

    print("KERNEL_OK")
</pallas_src>

<mosaic_0001>
module attributes {stable_mosaic.version = 11 : i64} {
  func.func @_mlp_kernel(%arg0: i32, %arg1: memref<32x128xbf16, #tpu.memory_space<vmem>>, %arg2: memref<128x128xbf16, #tpu.memory_space<vmem>>, %arg3: memref<1x128xf32, #tpu.memory_space<vmem>>, %arg4: memref<128x128xbf16, #tpu.memory_space<vmem>>, %arg5: memref<1x128xf32, #tpu.memory_space<vmem>>, %arg6: memref<128x128xbf16, #tpu.memory_space<vmem>>, %arg7: memref<1x128xf32, #tpu.memory_space<vmem>>, %arg8: memref<32x128xf32, #tpu.memory_space<vmem>>) attributes {dimension_semantics = [#tpu.dimension_semantics<parallel>], iteration_bounds = array<i64: 4>, scalar_prefetch = 0 : i64, scratch_operands = 0 : i64, tpu.core_type = #tpu.core_type<tc>, window_params = [{transform_indices = @transform_0, window_bounds = array<i64: 32, 128>}, {pipeline_mode = #tpu.pipeline_mode<synchronous>, transform_indices = @transform_1, window_bounds = array<i64: 128, 128>}, {pipeline_mode = #tpu.pipeline_mode<synchronous>, transform_indices = @transform_2, window_bounds = array<i64: 1, 128>}, {pipeline_mode = #tpu.pipeline_mode<synchronous>, transform_indices = @transform_3, window_bounds = array<i64: 128, 128>}, {pipeline_mode = #tpu.pipeline_mode<synchronous>, transform_indices = @transform_4, window_bounds = array<i64: 1, 128>}, {pipeline_mode = #tpu.pipeline_mode<synchronous>, transform_indices = @transform_5, window_bounds = array<i64: 128, 128>}, {pipeline_mode = #tpu.pipeline_mode<synchronous>, transform_indices = @transform_6, window_bounds = array<i64: 1, 128>}, {transform_indices = @transform_7, window_bounds = array<i64: 32, 128>}]} {
    %c0 = arith.constant 0 : index
    %c0_0 = arith.constant 0 : index
    %0 = vector.load %arg1[%c0, %c0_0] : memref<32x128xbf16, #tpu.memory_space<vmem>>, vector<32x128xbf16>
    %c0_1 = arith.constant 0 : index
    %c0_2 = arith.constant 0 : index
    %1 = vector.load %arg2[%c0_1, %c0_2] : memref<128x128xbf16, #tpu.memory_space<vmem>>, vector<128x128xbf16>
    %cst = arith.constant dense<0.000000e+00> : vector<32x128xf32>
    %2 = tpu.matmul %0, %1, %cst {dimension_numbers = #tpu.dot_dimension_numbers<[1], [0], [0], [1], [0, 0, 1, 1], [], []>} : vector<32x128xbf16>, vector<128x128xbf16>, vector<32x128xf32> -> vector<32x128xf32>
    %c0_3 = arith.constant 0 : index
    %c0_4 = arith.constant 0 : index
    %3 = vector.load %arg3[%c0_3, %c0_4] : memref<1x128xf32, #tpu.memory_space<vmem>>, vector<1x128xf32>
    %4 = vector.broadcast %3 : vector<1x128xf32> to vector<32x128xf32>
    %5 = arith.addf %2, %4 : vector<32x128xf32>
    %6 = math.tanh %5 : vector<32x128xf32>
    %7 = arith.truncf %6 : vector<32x128xf32> to vector<32x128xbf16>
    %c0_5 = arith.constant 0 : index
    %c0_6 = arith.constant 0 : index
    %8 = vector.load %arg4[%c0_5, %c0_6] : memref<128x128xbf16, #tpu.memory_space<vmem>>, vector<128x128xbf16>
    %cst_7 = arith.constant dense<0.000000e+00> : vector<32x128xf32>
    %9 = tpu.matmul %7, %8, %cst_7 {dimension_numbers = #tpu.dot_dimension_numbers<[1], [0], [0], [1], [0, 0, 1, 1], [], []>} : vector<32x128xbf16>, vector<128x128xbf16>, vector<32x128xf32> -> vector<32x128xf32>
    %c0_8 = arith.constant 0 : index
    %c0_9 = arith.constant 0 : index
    %10 = vector.load %arg5[%c0_8, %c0_9] : memref<1x128xf32, #tpu.memory_space<vmem>>, vector<1x128xf32>
    %11 = vector.broadcast %10 : vector<1x128xf32> to vector<32x128xf32>
    %12 = arith.addf %9, %11 : vector<32x128xf32>
    %13 = math.tanh %12 : vector<32x128xf32>
    %14 = arith.truncf %13 : vector<32x128xf32> to vector<32x128xbf16>
    %c0_10 = arith.constant 0 : index
    %c0_11 = arith.constant 0 : index
    %15 = vector.load %arg6[%c0_10, %c0_11] : memref<128x128xbf16, #tpu.memory_space<vmem>>, vector<128x128xbf16>
    %cst_12 = arith.constant dense<0.000000e+00> : vector<32x128xf32>
    %16 = tpu.matmul %14, %15, %cst_12 {dimension_numbers = #tpu.dot_dimension_numbers<[1], [0], [0], [1], [0, 0, 1, 1], [], []>} : vector<32x128xbf16>, vector<128x128xbf16>, vector<32x128xf32> -> vector<32x128xf32>
    %c0_13 = arith.constant 0 : index
    %c0_14 = arith.constant 0 : index
    %17 = vector.load %arg7[%c0_13, %c0_14] : memref<1x128xf32, #tpu.memory_space<vmem>>, vector<1x128xf32>
    %18 = vector.broadcast %17 : vector<1x128xf32> to vector<32x128xf32>
    %19 = arith.addf %16, %18 : vector<32x128xf32>
    %c0_15 = arith.constant 0 : index
    %c0_16 = arith.constant 0 : index
    %20 = vector.load %arg8[%c0_15, %c0_16] : memref<32x128xf32, #tpu.memory_space<vmem>>, vector<32x128xf32>
    tpu.vector_store %arg8[%c0_15, %c0_16], %19 {strides = array<i32>} : memref<32x128xf32, #tpu.memory_space<vmem>>, vector<32x128xf32>,
    return
  }
  func.func @transform_0(%arg0: i32) -> (i32, i32) {
    %c0_i32 = arith.constant 0 : i32
    %c0_i32_0 = arith.constant 0 : i32
    return %arg0, %c0_i32 : i32, i32
  }
  func.func @transform_1(%arg0: i32) -> (i32, i32) {
    %c0_i32 = arith.constant 0 : i32
    %c0_i32_0 = arith.constant 0 : i32
    %c0_i32_1 = arith.constant 0 : i32
    return %c0_i32, %c0_i32_0 : i32, i32
  }
  func.func @transform_2(%arg0: i32) -> (i32, i32) {
    %c0_i32 = arith.constant 0 : i32
    %c0_i32_0 = arith.constant 0 : i32
    %c0_i32_1 = arith.constant 0 : i32
    return %c0_i32, %c0_i32_0 : i32, i32
  }
  func.func @transform_3(%arg0: i32) -> (i32, i32) {
    %c0_i32 = arith.constant 0 : i32
    %c0_i32_0 = arith.constant 0 : i32
    %c0_i32_1 = arith.constant 0 : i32
    return %c0_i32, %c0_i32_0 : i32, i32
  }
  func.func @transform_4(%arg0: i32) -> (i32, i32) {
    %c0_i32 = arith.constant 0 : i32
    %c0_i32_0 = arith.constant 0 : i32
    %c0_i32_1 = arith.constant 0 : i32
    return %c0_i32, %c0_i32_0 : i32, i32
  }
  func.func @transform_5(%arg0: i32) -> (i32, i32) {
    %c0_i32 = arith.constant 0 : i32
    %c0_i32_0 = arith.constant 0 : i32
    %c0_i32_1 = arith.constant 0 : i32
    return %c0_i32, %c0_i32_0 : i32, i32
  }
  func.func @transform_6(%arg0: i32) -> (i32, i32) {
    %c0_i32 = arith.constant 0 : i32
    %c0_i32_0 = arith.constant 0 : i32
    %c0_i32_1 = arith.constant 0 : i32
    return %c0_i32, %c0_i32_0 : i32, i32
  }
  func.func @transform_7(%arg0: i32) -> (i32, i32) {
    %c0_i32 = arith.constant 0 : i32
    %c0_i32_0 = arith.constant 0 : i32
    return %arg0, %c0_i32 : i32, i32
  }
}

</mosaic_0001>

<bundles_post_ra>
// kernel: tpu_custom_call.1
= control target key start
LH: loop header
LB: loop body
LE: loop exit
PB: predicated region body
PF: predicated region fallthrough
CT: control target
= control target key end

     0   :  { %12 = vsyncpa [#allocation3], 0  ;;  %s1638_s0 = inlined_call_operand.hbm [shape: bf16[128,128], index: 0, kind: input, shape index: {}]   ;;  %s1639_s1 = inlined_call_operand.hbm [shape: bf16[128,128], index: 1, kind: input, shape index: {}]   ;;  %s1640_s2 = inlined_call_operand.vmem [shape: f32[1,128], index: 2, kind: input, shape index: {}]   ;;  %s1641_s3 = inlined_call_operand.hbm [shape: bf16[128,128], index: 3, kind: input, shape index: {}]   ;;  %s1642_s4 = inlined_call_operand.vmem [shape: f32[1,128], index: 4, kind: input, shape index: {}]   ;;  %s1643_s5 = inlined_call_operand.hbm [shape: bf16[128,128], index: 5, kind: input, shape index: {}]   ;;  %s1644_s6 = inlined_call_operand.vmem [shape: f32[1,128], index: 6, kind: input, shape index: {}]   ;;  %s1645_s7 = inlined_call_operand.hbm [shape: f32[128,128], index: 7, kind: output, shape index: {}]  }
   0x1   :  { %14 = vsyncpa [#allocation3 + $0x1], 0 }
   0x2   :  { %15 = vsyncpa [#allocation6], 0 }
   0x3   :  { %16 = vsyncpa [#allocation9], 0 }
   0x4   :  { %17 = vsyncpa [#allocation4], 0 }
   0x5   :  { %19 = vsyncpa [#allocation4 + $0x1], 0  ;;  %s1355_s24 = smov 0   ;;  %s1357_s25 = smov 0  }
   0x6   :  { %s1359_s26 = smov 0   ;;  %s1361_s27 = smov 0  }
   0x7 LB: > { %s1376_s28 = sadd.s32 4294967295, %s1304_s27   ;;  %s852_s29 = sadd.s32 4294967294, %s1304_s27   ;;  %s1304_s27 = sphi %s1361_s27, %s1670_s27   ;;  %s1300_s26 = sphi %s1359_s26, %s1669_s26   ;;  %s1296_s25 = sphi %s1357_s25, %s1668_s25   ;;  %s1292_s24 = sphi %s1355_s24, %s1667_s24  }
   0x8   : > { %p45_p0 = scmp.ne.s32.totalorder %s1296_s25, %s1292_s24  ;;  %p1646_p1 = scmp.eq.s32.totalorder %s1376_s28, 0 }
   0x9   : > { %p201_p3 = scmp.eq.s32.totalorder %s852_s29, 3  ;;  %p853_p5 = scmp.ge.s32.totalorder %s1304_s27, 1 }
   0xa   : > { %p1385_p4 = por %p1646_p1, %p45_p0  ;;  %p208_p7 = scmp.lt.s32.totalorder %s1304_s27, 5 }
   0xb   : > { %p1390_p6 = por %p201_p3, %p45_p0  ;;  %s1306_s10 = smov [#allocation5]  }
   0xc   : > { %s1650_s30 = scalar_select %p1385_p4, 1, 0 }
   0xd   : > { %s1651_s8 = scalar_select %p1390_p6, 1, 0 }
   0xe   : > { %p1395_p8 = pnand %p853_p5, %p208_p7  ;;  %s220_s11 = sshll.u32 %s1306_s10, 4  ;;  %s1399_s11 = int_to_ptr.vmem [resolvable:$true] %s220_s11 }
   0xf   : > { %1652 = sst [smem:[#allocation15_spill]] %s1651_s8  ;;  %s1307_s13 = smov [#allocation7]  }
  0x10   : > { %s1653_s9 = scalar_select %p1395_p8, 1, 0 }
  0x11   : > { %p1009_p9 = pneg %p1395_p8  ;;  %s236_s14 = sshll.u32 %s1307_s13, 4  ;;  %s1409_s14 = int_to_ptr.vmem [resolvable:$true] %s236_s14 }
  0x12   : > { %s1308_s15 = smov [#allocation8]   ;;  %s1116_s19 = scalar_lea.hbm %s1639_s1, 1024 }
  0x13   : > { %p1405_p10 = pnand %p1009_p9, %p1646_p1  ;;  %s1411_s16 = sshll.u32 %s1308_s15, 4  ;;  %s253_s16 = int_to_ptr.vmem [resolvable:$true] %s1411_s16 }
  0x14   : > { %p1117_p11 = scmp.ne.s32.totalorder %s1639_s1, %s1116_s19  ;;  %p1123_p3 = scmp.lt.u32.totalorder %s1116_s19, %s1639_s1 }
  0x15   : > { %p1421_p12 = pneg %p1405_p10 }
  0x17   : > { %p1119_p13 = pnand %p1421_p12, %p1117_p11 }
  0x19   : > { %p1120_p0 = pneg %p1119_p13 }
  0x1b   : > { %p1125_p5 = pnand %p1123_p3, %p1120_p0 }
  0x1d   : > { %1128 = shalt.err (!%p1125_p5)
}
  0x1e   : > { %s1129_s10 = scalar_lea.vmem %s1399_s11, 1024  ;;  %p1137_p2 = scmp.lt.s32.totalorder %s1399_s11, %s1399_s11 }
  0x1f   : > { %p1130_p7 = scmp.ne.s32.totalorder %s1399_s11, %s1129_s10  ;;  %p1138_p6 = scmp.lt.s32.totalorder %s1129_s10, %s1129_s10 }
  0x21   : > { %p1132_p9 = pnand %p1130_p7, %p1421_p12  ;;  %p1139_p11 = por %p1138_p6, %p1137_p2 }
  0x23   : > { %p1133_p1 = pneg %p1132_p9 }
  0x25   : > { %p1140_p13 = pnand %p1139_p11, %p1133_p1 }
  0x27   : > { %1143 = shalt.err (!%p1140_p13)
}
  0x28   : > { %s1309_s13 = smov 64   ;;  %s1310_s15 = smov 4  }
  0x29   : > { %1012 = dma.hbm_to_vmem [thread:$0]  (!%p1405_p10), %s1639_s1, 1024, %s1399_s11, [#allocation6], %s1309_s13, %s1309_s13, %s1310_s15  }
  0x2a   : > { %s1144_s21 = scalar_lea.hbm %s1641_s3, 1024 }
  0x2b   : > { %p1145_p1 = scmp.ne.s32.totalorder %s1641_s3, %s1144_s21  ;;  %p1151_p0 = scmp.lt.u32.totalorder %s1144_s21, %s1641_s3 }
  0x2d   : > { %p1147_p2 = pnand %p1145_p1, %p1421_p12 }
  0x2f   : > { %p1148_p6 = pneg %p1147_p2 }
  0x31   : > { %p1153_p3 = pnand %p1151_p0, %p1148_p6 }
  0x33   : > { %1156 = shalt.err (!%p1153_p3)
}
  0x34   : > { %s1157_s11 = scalar_lea.vmem %s1409_s14, 1024  ;;  %p1165_p11 = scmp.lt.s32.totalorder %s1409_s14, %s1409_s14 }
  0x35   : > { %p1158_p5 = scmp.ne.s32.totalorder %s1409_s14, %s1157_s11  ;;  %p1166_p13 = scmp.lt.s32.totalorder %s1157_s11, %s1157_s11 }
  0x37   : > { %p1160_p7 = pnand %p1158_p5, %p1421_p12  ;;  %p1167_p1 = por %p1166_p13, %p1165_p11 }
  0x39   : > { %p1161_p9 = pneg %p1160_p7 }
  0x3b   : > { %p1168_p2 = pnand %p1167_p1, %p1161_p9 }
  0x3d   : > { %1171 = shalt.err (!%p1168_p2)
}
  0x3e   : > { %1015 = dma.hbm_to_vmem [thread:$0]  (!%p1405_p10), %s1641_s3, 1024, %s1409_s14, [#allocation6], %s1309_s13, %s1309_s13, %s1310_s15  }
  0x3f   : > { %s1172_s20 = scalar_lea.hbm %s1643_s5, 1024 }
  0x40   : > { %p1173_p6 = scmp.ne.s32.totalorder %s1643_s5, %s1172_s20  ;;  %p1179_p5 = scmp.lt.u32.totalorder %s1172_s20, %s1643_s5 }
  0x42   : > { %p1175_p0 = pnand %p1173_p6, %p1421_p12 }
  0x44   : > { %p1176_p3 = pneg %p1175_p0 }
  0x46   : > { %p1181_p7 = pnand %p1179_p5, %p1176_p3 }
  0x48   : > { %1184 = shalt.err (!%p1181_p7)
}
  0x49   : > { %s1185_s11 = scalar_lea.vmem %s253_s16, 1024  ;;  %p1193_p1 = scmp.lt.s32.totalorder %s253_s16, %s253_s16 }
  0x4a   : > { %p1186_p9 = scmp.ne.s32.totalorder %s253_s16, %s1185_s11  ;;  %p1194_p2 = scmp.lt.s32.totalorder %s1185_s11, %s1185_s11 }
  0x4c   : > { %p1188_p11 = pnand %p1186_p9, %p1421_p12  ;;  %p1195_p4 = por %p1194_p2, %p1193_p1 }
  0x4e   : > { %p1189_p13 = pneg %p1188_p11 }
  0x50   : > { %p1196_p8 = pnand %p1195_p4, %p1189_p13 }
  0x52   : > { %1199 = shalt.err (!%p1196_p8)
}
  0x53   : > { %1018 = dma.hbm_to_vmem [thread:$0]  (!%p1405_p10), %s1643_s5, 1024, %s253_s16, [#allocation9], %s1309_s13, %s1309_s13, %s1310_s15  }
  0x54   : > { %s1494_s22 = sadd.s32 1, %s1304_s27   ;;  %s32_s17 = sadd.s32 1, %s1300_s26 }
  0x55   : > { %s29_s12 = ssub.s32 %s1304_s27, %s1494_s22  ;;  %p39_p8 = scmp.ne.s32.totalorder %s1300_s26, %s1296_s25 }
  0x56   : > { %p30_p4 = scmp.eq.s32.totalorder %s29_s12, 0  ;;  %p40_p12 = scmp.eq.s32.totalorder %s1304_s27, 0 }
  0x57   : > { %p1030_p6 = scmp.lt.s32.totalorder %s1304_s27, 4  ;;  %p1656_p3 = scmp.eq.s32.totalorder %s1376_s28, 3 }
  0x58   : > { %s1504_s18 = scalar_select %p30_p4, %s1300_s26, %s32_s17  }
  0x59   : > { %p41_p0 = por %p40_p12, %p39_p8  ;;  %p1508_p5 = por %p1656_p3, %p39_p8 }
  0x5a   : > { %s269_s20 = sand.u32 1, %s1300_s26   ;;  %s901_s21 = sshll.u32 %s1304_s27, 8 }
  0x5b   : > { %s858_s16 = sshll.u32 %s269_s20, 4  ;;  %s1517_s10 = scalar_lea.hbm %s1638_s0, %s901_s21 }
  0x5c   : > { %s273_s11 = scalar_lea.vmem [#allocation2], %s858_s16  ;;  %p1519_p10 = pnand %p1030_p6, %p41_p0 }
  0x5d   : > { %s280_s14 = sshll.u32 %s273_s11, 4  ;;  %s1525_s12 = scalar_lea.sflag [#allocation3], %s269_s20  ;;  %s1523_s14 = int_to_ptr.vmem [resolvable:$true] %s280_s14 }
  0x5e   : > { %s1200_s17 = scalar_lea.hbm %s1517_s10, 256  ;;  %p1202_p9 = pneg %p1519_p10 }
  0x5f   : > { %p1201_p7 = scmp.ne.s32.totalorder %s1517_s10, %s1200_s17  ;;  %s1205_s23 = scalar_lea.hbm %s1638_s0, 1024 }
  0x60   : > { %p1206_p1 = scmp.lt.u32.totalorder %s1517_s10, %s1638_s0  ;;  %p1207_p2 = scmp.lt.u32.totalorder %s1205_s23, %s1200_s17 }
  0x61   : > { %p1203_p11 = pnand %p1202_p9, %p1201_p7  ;;  %p1209_p8 = scmp.lt.u32.totalorder %s1200_s17, %s1517_s10 }
  0x62   : > { %p1208_p4 = por %p1207_p2, %p1206_p1 }
  0x63   : > { %p1204_p13 = pneg %p1203_p11 }
  0x64   : > { %p1210_p12 = por %p1209_p8, %p1208_p4 }
  0x66   : > { %p1211_p6 = pnand %p1210_p12, %p1204_p13 }
  0x68   : > { %1214 = shalt.err (!%p1211_p6)
}
  0x69   : > { %s1215_s20 = scalar_lea.vmem %s1523_s14, 256  ;;  %s1311_s21 = smov [#allocation2]  }
  0x6a   : > { %p1216_p0 = scmp.ne.s32.totalorder %s1523_s14, %s1215_s20  ;;  %s1220_s16 = sshll.u32 %s1311_s21, 4  ;;  %s1221_s16 = int_to_ptr.vmem [resolvable:$false] %s1220_s16 }
  0x6b   : > { %s1222_s29 = scalar_lea.vmem %s1221_s16, 512  ;;  %p1223_p11 = scmp.lt.s32.totalorder %s1523_s14, %s1221_s16 }
  0x6c   : > { %p1218_p3 = pnand %p1216_p0, %p1202_p9  ;;  %p1224_p1 = scmp.lt.s32.totalorder %s1222_s29, %s1215_s20 }
  0x6e   : > { %p1219_p7 = pneg %p1218_p3  ;;  %p1225_p2 = por %p1224_p1, %p1223_p11 }
  0x70   : > { %p1226_p4 = pnand %p1225_p2, %p1219_p7 }
  0x72   : > { %1229 = shalt.err (!%p1226_p4)
}
  0x73   : > { %1022 = dma.hbm_to_vmem [thread:$0]  (!%p1519_p10), %s1517_s10, 256, %s1523_s14, %s1525_s12, %s1309_s13, %s1309_s13, %s1310_s15  }
  0x74   : > { %p1659_p9 = scmp.ne.s32.totalorder %s1653_s9, 0 }
  0x75   : > { %s1559_s17 = sand.u32 (!%p1659_p9), 1, %s1296_s25   ;;  %p1660_p13 = scmp.ne.s32.totalorder (!%p1659_p9), %s1650_s30, 0 }
  0x76   : > { %292 = sbr.rel (%p1659_p9) target bundleno = 860 (0x35c), region = 48  ;;  %s862_s23 = sshll.u32 (!%p1659_p9), %s1559_s17, 4 }
  0x77   : > { %s295_s11 = scalar_lea.sflag (!%p1659_p9), [#allocation3], %s1559_s17  ;;  %s1563_s20 = scalar_lea.vmem (!%p1659_p9), [#allocation2], %s862_s23 }
  0x7d   : > { %1275 = dma.done.wait (%p1660_p13), %s295_s11, 256  }
  0x7e   : > { %1277 = vsyncadd (%p1660_p13), %s295_s11, 4294967040  ;;  %p1661_p10 = scmp.eq.s32.totalorder %s1376_s28, 0 }
  0x80   : > { %1279 = dma.done.wait (%p1661_p10), [#allocation6], 2048   ;;  %p1662_p8 = pmov %p1661_p10 }
  0x82   : > { %1281 = vsyncadd (%p1662_p8), [#allocation6], 4294965248  ;;  %p1663_p12 = pmov %p1662_p8 }
  0x83   : > { %p1664_p6 = pmov %p1662_p8 }
  0x84   : > { %1283 = dma.done.wait (%p1663_p12), [#allocation9], 1024  }
  0x85   : > { %1285 = vsyncadd (%p1664_p6), [#allocation9], 4294966272  ;;  %v1074_v0 = vld [vmem:[#allocation5] sm:$0xff]   ;;  %v1075_v1 = vld [vmem:[#allocation5 + $0x8] sm:$0xff]   ;;  %s866_s10 = sshll.u32 %s1559_s17, 5  ;;  %s902_s16 = sshll.u32 %s1376_s28, 9 }
  0x86   : > { %933 = vmatprep.subr.bf16.mxu0 %v1074_v0  ;;  %v1076_v2 = vld [vmem:[#allocation5 + $0x10] sm:$0xff]   ;;  %v1077_v3 = vld [vmem:[#allocation5 + $0x18] sm:$0xff]   ;;  %v1078_v5 = vld [vmem:[#allocation5 + $0x20] sm:$0xff]   ;;  %s340_s12 = scalar_lea.vmem [#allocation10], %s866_s10  ;;  %s1595_s11 = scalar_lea.hbm %s1645_s7, %s902_s16 }
  0x87   : > { %934 = vmatpush3.bf16.msra.mxu0 %v1074_v0  ;;  %v1082_v4 = vld [vmem:[%s1563_s20] sm:$0xff]   ;;  %v1085_v7 = vld [vmem:[#allocation7 + $0x8] sm:$0xff]   ;;  %v1081_v11 = vld [vmem:[#allocation5 + $0x38] sm:$0xff]   ;;  %s750_s21 = sshll.u32 %s340_s12, 4  ;;  %s737_s28 = scalar_lea.sflag [#allocation4], %s1559_s17  ;;  %s1590_s21 = int_to_ptr.vmem [resolvable:$true] %s750_s21 }
  0x88   : > { %935 = vmatprep.subr.bf16.mxu0 %v1075_v1  ;;  %949 = vmatprep.mubr.bf16.mxu0 %v1082_v4  ;;  %v1084_v6 = vld [vmem:[#allocation7] sm:$0xff]   ;;  %v1086_v8 = vld [vmem:[#allocation7 + $0x10] sm:$0xff]   ;;  %v1079_v9 = vld [vmem:[#allocation5 + $0x28] sm:$0xff]   ;;  %s1312_s30 = smov [#allocation10]  }
  0x89   : > { %953 = vmatprep.subr.bf16.mxu1 %v1084_v6  ;;  %v1080_v10 = vld [vmem:[#allocation5 + $0x30] sm:$0xff]   ;;  %v1083_v12 = vld [vmem:[%s1563_s20 + $0x8] sm:$0xff]   ;;  %v1088_v14 = vld [vmem:[#allocation7 + $0x20] sm:$0xff]   ;;  %s1230_s20 = scalar_lea.vmem %s1590_s21, 512  ;;  %s1234_s9 = sshll.u32 %s1312_s30, 4  ;;  %s1235_s9 = int_to_ptr.vmem [resolvable:$false] %s1234_s9 }
  0x8a   : > { %954 = vmatpush3.bf16.msra.mxu1 %v1084_v6  ;;  %v1087_v13 = vld [vmem:[#allocation7 + $0x18] sm:$0xff]   ;;  %v1089_v15 = vld [vmem:[#allocation7 + $0x28] sm:$0xff]   ;;  %v1090_v16 = vld [vmem:[#allocation7 + $0x30] sm:$0xff]   ;;  %p1231_p0 = scmp.ne.s32.totalorder %s1590_s21, %s1230_s20  ;;  %s1236_s13 = scalar_lea.vmem %s1235_s9, 1024 }
  0x8b   : > { %936 = vmatpush3.bf16.msra.mxu0 %v1075_v1  ;;  %955 = vmatprep.subr.bf16.mxu1 %v1085_v7  ;;  %v1091_v17 = vld [vmem:[#allocation7 + $0x38] sm:$0xff]   ;;  %v1092_v18 = vld [vmem:[#allocation8] sm:$0xff]   ;;  %v1093_v19 = vld [vmem:[#allocation8 + $0x8] sm:$0xff]   ;;  %p1237_p11 = scmp.lt.s32.totalorder %s1590_s21, %s1235_s9  ;;  %p1238_p1 = scmp.lt.s32.totalorder %s1236_s13, %s1230_s20 }
  0x8c   : > { %937 = vmatprep.subr.bf16.mxu0 %v1076_v2  ;;  %v1094_v20 = vld [vmem:[#allocation8 + $0x10] sm:$0xff]   ;;  %v867_v21 = vld [vmem:[%s1640_s2] ss:$0 sm:$0xff]  ;;  %v1095_v36 = vld [vmem:[#allocation8 + $0x18] sm:$0xff]   ;;  %p1232_p3 = pnand %p1231_p0, %p1508_p5 }
  0x8d   : > { %v1096_v37 = vld [vmem:[#allocation8 + $0x20] sm:$0xff]   ;;  %v1097_v38 = vld [vmem:[#allocation8 + $0x28] sm:$0xff]   ;;  %v1098_v39 = vld [vmem:[#allocation8 + $0x30] sm:$0xff]   ;;  %p1239_p2 = por %p1238_p1, %p1237_p11 }
  0x8e   : > { %956 = vmatpush3.bf16.msra.mxu1 %v1085_v7  ;;  %v1099_v40 = vld [vmem:[#allocation8 + $0x38] sm:$0xff]   ;;  %v878_v41 = vld [vmem:[%s1642_s4] ss:$0 sm:$0xff]  ;;  %p1233_p7 = pneg %p1232_p3 }
  0x8f   : > { %938 = vmatpush3.bf16.msra.mxu0 %v1076_v2  ;;  %957 = vmatprep.subr.bf16.mxu1 %v1086_v8  ;;  %v887_v56 = vld [vmem:[%s1644_s6] ss:$0 sm:$0xff] }
  0x90   : > { %939 = vmatprep.subr.bf16.mxu0 %v1077_v3  ;;  %p1240_p4 = pnand %p1239_p2, %p1233_p7 }
  0x92   : > { %958 = vmatpush3.bf16.msra.mxu1 %v1086_v8 }
  0x93   : > { %940 = vmatpush3.bf16.msra.mxu0 %v1077_v3  ;;  %959 = vmatprep.subr.bf16.mxu1 %v1087_v13 }
  0x94   : > { %941 = vmatprep.subr.bf16.mxu0 %v1078_v5 }
  0x96   : > { %960 = vmatpush3.bf16.msra.mxu1 %v1087_v13 }
  0x97   : > { %942 = vmatpush3.bf16.msra.mxu0 %v1078_v5  ;;  %961 = vmatprep.subr.bf16.mxu1 %v1088_v14 }
  0x98   : > { %943 = vmatprep.subr.bf16.mxu0 %v1079_v9 }
  0x9a   : > { %962 = vmatpush3.bf16.msra.mxu1 %v1088_v14 }
  0x9b   : > { %944 = vmatpush3.bf16.msra.mxu0 %v1079_v9  ;;  %963 = vmatprep.subr.bf16.mxu1 %v1089_v15 }
  0x9c   : > { %945 = vmatprep.subr.bf16.mxu0 %v1080_v10 }
  0x9e   : > { %964 = vmatpush3.bf16.msra.mxu1 %v1089_v15 }
  0x9f   : > { %946 = vmatpush3.bf16.msra.mxu0 %v1080_v10  ;;  %965 = vmatprep.subr.bf16.mxu1 %v1090_v16 }
  0xa0   : > { %947 = vmatprep.subr.bf16.mxu0 %v1081_v11 }
  0xa2   : > { %966 = vmatpush3.bf16.msra.mxu1 %v1090_v16 }
  0xa3   : > { %948 = vmatpush3.bf16.msra.mxu0 %v1081_v11  ;;  %967 = vmatprep.subr.bf16.mxu1 %v1091_v17 }
  0xa4   : > { %973 = vmatprep.subr.bf16.mxu0 %v1092_v18 }
  0xa6   : > { %950 = vmatmul.mubr.bf16.vlgmr.msra.gmra.mrb[0].mxu0 %v1083_v12  ;;  %968 = vmatpush3.bf16.msra.mxu1 %v1091_v17 }
  0xa7   : > { %974 = vmatpush3.bf16.msra.mxu0 %v1092_v18 }
  0xa8   : > { %975 = vmatprep.subr.bf16.mxu0 %v1093_v19 }
  0xab   : > { %976 = vmatpush3.bf16.msra.mxu0 %v1093_v19 }
  0xac   : > { %977 = vmatprep.subr.bf16.mxu0 %v1094_v20 }
  0xaf   : > { %978 = vmatpush3.bf16.msra.mxu0 %v1094_v20 }
  0xb0   : > { %979 = vmatprep.subr.bf16.mxu0 %v1095_v36 }
  0xb3   : > { %980 = vmatpush3.bf16.msra.mxu0 %v1095_v36 }
  0xb4   : > { %981 = vmatprep.subr.bf16.mxu0 %v1096_v37 }
  0xb7   : > { %982 = vmatpush3.bf16.msra.mxu0 %v1096_v37 }
  0xb8   : > { %983 = vmatprep.subr.bf16.mxu0 %v1097_v38 }
  0xbb   : > { %984 = vmatpush3.bf16.msra.mxu0 %v1097_v38 }
  0xbc   : > { %985 = vmatprep.subr.bf16.mxu0 %v1098_v39 }
  0xbf   : > { %986 = vmatpush3.bf16.msra.mxu0 %v1098_v39 }
  0xc0   : > { %987 = vmatprep.subr.bf16.mxu0 %v1099_v40 }
  0xc3   : > { %988 = vmatpush3.bf16.msra.mxu0 %v1099_v40 }
 0x179   : > { %v951_v22 = vpop.f32.mrb[0].mxu0 }
 0x17a   : > { %v474_v23 = vadd.f32 %v951_v22, %v867_v21  ;;  %v465_v24 = vpop.f32.mrb[1].mxu0 }
 0x17b   : > { %v466_v25 = vadd.f32 %v867_v21, %v465_v24  ;;  %v952_v26 = vpop.f32.mrb[2].mxu0 }
 0x17c   : > { %1100 = vtanh.f32 %v474_v23  ;;  %v477_v27 = vadd.f32 %v952_v26, %v867_v21  ;;  %v468_v28 = vpop.f32.mrb[3].mxu0 }
 0x17d   : > { %1102 = vtanh.f32 %v466_v25  ;;  %v469_v29 = vadd.f32 %v867_v21, %v468_v28 }
 0x17e   : > { %1104 = vtanh.f32 %v477_v27 }
 0x17f   : > { %1106 = vtanh.f32 %v469_v29 }
 0x186   : > { %v1101_v30 = vpop.eup %1100 }
 0x187   : > { %v1103_v31 = vpop.eup %1102 }
 0x188   : > { %v1105_v32 = vpop.eup %1104 }
 0x189   : > { %v1107_v33 = vpop.eup %1106  ;;  %v485_v34 = vpack.c.bf16 %v1105_v32, %v1101_v30 }
 0x18a   : > { %v484_v35 = vpack.c.bf16 %v1107_v33, %v1103_v31 }
 0x18c   : > { %969 = vmatprep.mubr.bf16.mxu1 %v484_v35 }
 0x18d   : > { %970 = vmatmul.mubr.bf16.vlgmr.msra.gmra.mrb[0].mxu1 %v485_v34 }
 0x260   : > { %v971_v42 = vpop.f32.mrb[0].mxu1 }
 0x261   : > { %v600_v43 = vadd.f32 %v971_v42, %v878_v41  ;;  %v591_v44 = vpop.f32.mrb[1].mxu1 }
 0x262   : > { %v592_v45 = vadd.f32 %v878_v41, %v591_v44  ;;  %v972_v46 = vpop.f32.mrb[2].mxu1 }
 0x263   : > { %1108 = vtanh.f32 %v600_v43  ;;  %v603_v47 = vadd.f32 %v972_v46, %v878_v41  ;;  %v594_v48 = vpop.f32.mrb[3].mxu1 }
 0x264   : > { %1110 = vtanh.f32 %v592_v45  ;;  %v595_v49 = vadd.f32 %v878_v41, %v594_v48 }
 0x265   : > { %1112 = vtanh.f32 %v603_v47 }
 0x266   : > { %1114 = vtanh.f32 %v595_v49 }
 0x26d   : > { %v1109_v50 = vpop.eup %1108 }
 0x26e   : > { %v1111_v51 = vpop.eup %1110 }
 0x26f   : > { %v1113_v52 = vpop.eup %1112 }
 0x270   : > { %v1115_v53 = vpop.eup %1114  ;;  %v611_v54 = vpack.c.bf16 %v1113_v52, %v1109_v50 }
 0x271   : > { %v610_v55 = vpack.c.bf16 %v1115_v53, %v1111_v51 }
 0x273   : > { %989 = vmatprep.mubr.bf16.mxu0 %v610_v55 }
 0x274   : > { %990 = vmatmul.mubr.bf16.vlgmr.msra.gmra.mrb[4].mxu0 %v611_v54 }
 0x347   : > { %v991_v57 = vpop.f32.mrb[4].mxu0 }
 0x348   : > { %v726_v58 = vadd.f32 %v991_v57, %v887_v56  ;;  %v717_v59 = vpop.f32.mrb[5].mxu0 }
 0x349   : > { %v718_v60 = vadd.f32 %v887_v56, %v717_v59  ;;  %v992_v61 = vpop.f32.mrb[6].mxu0 }
 0x34a   : > { %734 = vst [vmem:[%s340_s12 + $0x10] sm:$0xff] %v726_v58  ;;  %v729_v62 = vadd.f32 %v992_v61, %v887_v56  ;;  %v720_v63 = vpop.f32.mrb[7].mxu0 }
 0x34b   : > { %732 = vst [vmem:[%s340_s12] sm:$0xff] %v718_v60  ;;  %v721_v0 = vadd.f32 %v887_v56, %v720_v63 }
 0x34c   : > { %735 = vst [vmem:[%s340_s12 + $0x18] sm:$0xff] %v729_v62 }
 0x34d   : > { %733 = vst [vmem:[%s340_s12 + $0x8] sm:$0xff] %v721_v0 }
 0x34e   : > { %1243 = shalt.err (!%p1240_p4)
}
 0x34f   : > { %s1244_s15 = scalar_lea.hbm %s1595_s11, 512  ;;  %s1248_s8 = scalar_lea.hbm %s1645_s7, 2048 }
 0x350   : > { %p1245_p9 = scmp.ne.s32.totalorder %s1595_s11, %s1244_s15  ;;  %p1249_p8 = scmp.lt.u32.totalorder %s1595_s11, %s1645_s7 }
 0x351   : > { %p1250_p12 = scmp.lt.u32.totalorder %s1248_s8, %s1244_s15  ;;  %p1252_p0 = scmp.lt.u32.totalorder %s1244_s15, %s1595_s11 }
 0x352   : > { %p1246_p13 = pnand %p1245_p9, %p1508_p5 }
 0x353   : > { %p1251_p6 = por %p1250_p12, %p1249_p8 }
 0x354   : > { %p1247_p10 = pneg %p1246_p13 }
 0x355   : > { %p1253_p3 = por %p1252_p0, %p1251_p6 }
 0x357   : > { %p1254_p7 = pnand %p1253_p3, %p1247_p10 }
 0x359   : > { %1257 = shalt.err (!%p1254_p7)
}
 0x35a   : > { %s1313_s29 = smov 128   ;;  %s1314_s23 = smov 8  }
 0x35b   : > { %1007 = dma.vmem_to_hbm [thread:$0]  (%p1508_p5), %s1590_s21, 512, %s1595_s11, %s737_s28, %s1313_s29, %s1313_s29, %s1314_s23  }
 0x35c PF: > { %s1665_s20 = sld [smem:[#allocation15_spill]]  ;;  %p1034_p11 = scmp.ge.s32.totalorder %s1304_s27, 2 }
 0x35d   : > { %s765_s30 = sand.u32 1, %s1292_s24  }
 0x35e   : > { %s766_s9 = scalar_lea.sflag [#allocation4], %s765_s30 }
 0x362   : > { %p1666_p1 = scmp.ne.s32.totalorder %s1665_s20, 0 }
 0x364   : > { %p1024_p2 = pnand %p1034_p11, %p1666_p1 }
 0x366   : > { %1287 = dma.done.wait (!%p1024_p2), %s766_s9, 512  }
 0x367   : > { %1289 = vsyncadd (!%p1024_p2), %s766_s9, 4294966784  ;;  %p22_p4 = scmp.ge.s32.totalorder %s1494_s22, 6   ;;  %s1667_s24 = smov %s1296_s25 }
 0x368   : > { %s1668_s25 = smov %s1300_s26  ;;  %s1669_s26 = smov %s1504_s18 }
 0x369   : > { %s1670_s27 = smov %s1494_s22  ;;  %24 = sbr.rel (!%p22_p4) target bundleno = 7 (0x7), region = 105 }
 0x370   :  { %771 = vsyncpa [#allocation3], 1 }
 0x371   :  { %773 = vsyncpa [#allocation3 + $0x1], 1 }
 0x372   :  { %774 = vsyncpa [#allocation6], 1 }
 0x373   :  { %775 = vsyncpa [#allocation9], 1 }
 0x374   :  { %776 = vsyncpa [#allocation4], 1 }
 0x375   :  { %778 = vsyncpa [#allocation4 + $0x1], 1 }

</bundles_post_ra>
